<compile_context>
chip_gen: v6e
topology: v6e:2x2x1
jax: 0.10.0
libtpu: 0.0.40
codegen_flags: <defaults>
</compile_context>

<pallas_src>
import math
from functools import partial

import jax
import jax.numpy as jnp
import numpy as np
from jax import lax
from jax.experimental import pallas as pl
from jax.experimental.pallas import tpu as pltpu


# --------------------------------------------------------------------------
# Helpers: chip-aware tile defaults and explicit VMEM limits.
# --------------------------------------------------------------------------
def _default_tile():
    try:
        kind = jax.devices()[0].device_kind.lower()
    except Exception:
        return 128
    if "v5 lite" in kind or "v5e" in kind or "v5litepod" in kind:
        return 128          # v5e: 4x128^2 MXU, 16 MiB default scoped VMEM
    return 256              # v6e / v7x: 2x256^2 MXU


def _pick_tile(dim, pref, align):
    """Largest multiple-of-`align` divisor of `dim` that is <= pref (or dim)."""
    if dim <= pref:
        return dim
    t = (pref // align) * align
    while t >= align:
        if dim % t == 0:
            return t
        t -= align
    return dim


def _vmem_limit(est_bytes):
    """Explicit scoped-VMEM limit from the real footprint, capped below physical."""
    try:
        phys = pltpu.get_tpu_info().vmem_capacity_bytes
    except Exception:
        phys = 64 << 20     # v7x per-TC physical VMEM (smallest of the three)
    want = int(2 * est_bytes) + (8 << 20)
    return int(min(max(want, 32 << 20), int(phys * 0.9)))


# --------------------------------------------------------------------------
# Tiled linear kernel: y = x @ W^T + b   (used for in/out projections).
# --------------------------------------------------------------------------
def _linear_kernel(x_ref, wt_ref, b_ref, o_ref, acc_ref, *, compute_dtype):
    ki = pl.program_id(2)

    @pl.when(ki == 0)
    def _():
        acc_ref[...] = jnp.zeros_like(acc_ref)

    acc_ref[...] += jnp.dot(
        x_ref[...].astype(compute_dtype),
        wt_ref[...].astype(compute_dtype),
        preferred_element_type=jnp.float32)

    @pl.when(ki == pl.num_programs(2) - 1)
    def _():
        o_ref[...] = (acc_ref[...] + b_ref[...].astype(jnp.float32)).astype(o_ref.dtype)


def linear_pallas(x2d, w_t, b, *, compute_dtype=jnp.float32,
                  tm=None, tn=None, tk=None):
    """x2d: (M, K), w_t: (K, N) (= W.T), b: (1, N)  ->  (M, N)."""
    M, K = x2d.shape
    K2, N = w_t.shape
    assert K == K2
    pref = _default_tile()
    tm = tm or _pick_tile(M, pref, 8)
    tn = tn or _pick_tile(N, pref, 128)
    tk = tk or _pick_tile(K, pref, 128)
    assert M % tm == 0 and N % tn == 0 and K % tk == 0

    itm = x2d.dtype.itemsize
    est = (2 * (tm * tk + tk * tn + tn) * itm   # double-buffered input blocks
           + 2 * tm * tn * itm                  # output block
           + tm * tn * 4)                       # f32 accumulator

    kernel = partial(_linear_kernel, compute_dtype=compute_dtype)
    return pl.pallas_call(
        kernel,
        out_shape=jax.ShapeDtypeStruct((M, N), x2d.dtype),
        grid_spec=pltpu.PrefetchScalarGridSpec(
            num_scalar_prefetch=0,
            grid=(M // tm, N // tn, K // tk),
            in_specs=[
                pl.BlockSpec((tm, tk), lambda i, j, k: (i, k)),
                pl.BlockSpec((tk, tn), lambda i, j, k: (k, j)),
                pl.BlockSpec((1, tn), lambda i, j, k: (0, j)),
            ],
            out_specs=pl.BlockSpec((tm, tn), lambda i, j, k: (i, j)),
            scratch_shapes=[pltpu.VMEM((tm, tn), jnp.float32)],
        ),
        compiler_params=pltpu.CompilerParams(
            dimension_semantics=("parallel", "parallel", "arbitrary"),
            vmem_limit_bytes=_vmem_limit(est)),
    )(x2d, w_t, b)


# --------------------------------------------------------------------------
# Attention core kernel: head-major Q, K, V -> context (softmax over heads).
# --------------------------------------------------------------------------
def _attention_kernel(q_ref, k_ref, v_ref, o_ref, s_scr, acc_scr, *,
                      n_heads, causal, tq, tk, compute_dtype, score_dtype):
    qi = pl.program_id(1)
    ki = pl.program_id(2)
    nk = pl.num_programs(2)

    @pl.when(ki == 0)
    def _():
        acc_scr[...] = jnp.zeros_like(acc_scr)

    if causal:
        row = lax.broadcasted_iota(jnp.int32, (tq, tk), 0) + qi * tq
        col = lax.broadcasted_iota(jnp.int32, (tq, tk), 1) + ki * tk
        future = col > row                                    # triu(1)

    # Pass 1: per-head scores (scale already folded into q) with a running
    # max over heads fused into the same loop (no extra score reload pass).
    # NOTE: for very large n_heads, convert these Python loops to
    # lax.fori_loop(..., unroll=<small>) to bound vreg live ranges.
    m = None
    for h in range(n_heads):
        s_h = lax.dot_general(
            q_ref[0, h].astype(compute_dtype),
            k_ref[0, h].astype(compute_dtype),
            (((1,), (1,)), ((), ())),
            preferred_element_type=jnp.float32)               # (tq, tk) = q @ k^T
        if causal:
            s_h = jnp.where(future, -jnp.inf, s_h)
        s_scr[h] = s_h.astype(score_dtype)
        m = s_h if m is None else jnp.maximum(m, s_h)

    # Pass 2: softmax ACROSS HEADS (dim=1 of the torch module) per (i, j):
    # exps overwrite the score scratch in place; single denominator.
    denom = None
    for h in range(n_heads):
        e_h = jnp.exp(s_scr[h].astype(jnp.float32) - m)
        s_scr[h] = e_h.astype(score_dtype)
        denom = e_h if denom is None else denom + e_h

    if compute_dtype == jnp.float32:
        inv = 1.0 / denom                 # exact: keeps the 1e-4 tolerance
    else:
        inv = pl.reciprocal(denom, approx=True)   # EUP slot, free filler

    # Pass 3: normalized p @ v accumulated per head into the aligned
    # head-major (H, tq, D) accumulator (no unaligned lane-slice RMW).
    for h in range(n_heads):
        p_h = (s_scr[h].astype(jnp.float32) * inv).astype(compute_dtype)
        acc_scr[h] += jnp.dot(p_h, v_ref[0, h].astype(compute_dtype),
                              preferred_element_type=jnp.float32)

    @pl.when(ki == nk - 1)
    def _():
        o_ref[0] = acc_scr[...].astype(o_ref.dtype)


def _attention_core(q, k, v, *, causal, compute_dtype, score_dtype,
                    tq=None, tk=None):
    """q, k, v: (B, H, L, D) head-major; q pre-scaled by 1/sqrt(D)."""
    B, H, L, D = q.shape
    pref = _default_tile()
    tq = tq or _pick_tile(L, pref, 8)
    tk = tk or _pick_tile(L, pref, 8)
    assert L % tq == 0 and L % tk == 0, "tq / tk must divide seq_len"
    nq, nk = L // tq, L // tk

    itm = q.dtype.itemsize
    est = (2 * (H * tq * D + 2 * H * tk * D) * itm          # q/k/v blocks x2 bufs
           + 2 * H * tq * D * itm                           # output block
           + H * tq * tk * jnp.dtype(score_dtype).itemsize  # stacked scores/exps
           + H * tq * D * 4)                                # f32 accumulator

    kernel = partial(_attention_kernel, n_heads=H, causal=causal, tq=tq, tk=tk,
                     compute_dtype=compute_dtype, score_dtype=score_dtype)

    return pl.pallas_call(
        kernel,
        out_shape=jax.ShapeDtypeStruct((B, H, L, D), q.dtype),
        grid_spec=pltpu.PrefetchScalarGridSpec(
            num_scalar_prefetch=0,
            grid=(B, nq, nk),
            in_specs=[
                pl.BlockSpec((1, H, tq, D), lambda b, i, j: (b, 0, i, 0)),  # q
                pl.BlockSpec((1, H, tk, D), lambda b, i, j: (b, 0, j, 0)),  # k
                pl.BlockSpec((1, H, tk, D), lambda b, i, j: (b, 0, j, 0)),  # v
            ],
            out_specs=pl.BlockSpec((1, H, tq, D), lambda b, i, j: (b, 0, i, 0)),
            scratch_shapes=[
                pltpu.VMEM((H, tq, tk), score_dtype),   # stacked scores / exps
                pltpu.VMEM((H, tq, D), jnp.float32),    # head-major accumulator
            ],
        ),
        compiler_params=pltpu.CompilerParams(
            dimension_semantics=("parallel", "parallel", "arbitrary"),
            vmem_limit_bytes=_vmem_limit(est)),
    )(q, k, v)


# --------------------------------------------------------------------------
# Full module: in_project -> attention (softmax over heads) -> out_project.
# --------------------------------------------------------------------------
def self_attention(x, params, *, n_heads, causal=True,
                   compute_dtype=jnp.float32, tq=None, tk=None):
    B, L, E = x.shape
    assert E % n_heads == 0
    D = E // n_heads
    score_dtype = jnp.float32 if compute_dtype == jnp.float32 else jnp.bfloat16

    # ---- in-projection weights, with 1/sqrt(D) folded into the Q rows (free).
    inv_sqrt_d = 1.0 / math.sqrt(D)
    w_in_t = params["w_in"].T.astype(jnp.float32)                   # (E, 3E)
    b_in = params["b_in"].astype(jnp.float32)                       # (3E,)
    scale_vec = jnp.concatenate([jnp.full((E,), inv_sqrt_d, jnp.float32),
                                 jnp.ones((2 * E,), jnp.float32)])
    w_in_t = w_in_t * scale_vec[None, :]
    b_in = b_in * scale_vec

    # ---- QKV projection computed ONCE (no per-q-block recompute).
    qkv = linear_pallas(x.reshape(B * L, E), w_in_t, b_in.reshape(1, 3 * E),
                        compute_dtype=compute_dtype)                # (B*L, 3E)
    qkv = qkv.reshape(B, L, 3, n_heads, D).transpose(2, 0, 3, 1, 4)  # (3,B,H,L,D)
    q, k, v = qkv[0], qkv[1], qkv[2]

    # ---- attention core (softmax over heads, causal -inf mask).
    ctx = _attention_core(q, k, v, causal=causal, compute_dtype=compute_dtype,
                          score_dtype=score_dtype, tq=tq, tk=tk)     # (B,H,L,D)
    ctx = ctx.transpose(0, 2, 1, 3).reshape(B * L, E)                # b l (h d)

    # ---- output projection (lane-dense (·, E) output for real E >= 128).
    w_out_t = params["w_out"].T.astype(jnp.float32)                  # (E, E)
    b_out = params["b_out"].astype(jnp.float32).reshape(1, E)
    out = linear_pallas(ctx, w_out_t, b_out, compute_dtype=compute_dtype)
    return out.reshape(B, L, E)


# --------------------------------------------------------------------------
# Pure-JAX reference matching the torch module (incl. softmax over heads).
# --------------------------------------------------------------------------
def self_attention_ref(x, params, *, n_heads, causal=True):
    B, L, E = x.shape
    D = E // n_heads
    qkv = x @ params["w_in"].T + params["b_in"]
    q, k, v = jnp.split(qkv, 3, axis=-1)

    def to_heads(t):
        return t.reshape(B, L, n_heads, D).transpose(0, 2, 1, 3)

    q, k, v = to_heads(q), to_heads(k), to_heads(v)
    w = jnp.einsum("bhld,bhmd->bhlm", q, k)
    if causal:
        mask = jnp.triu(jnp.ones((L, L), dtype=bool), 1)
        w = jnp.where(mask, -jnp.inf, w)
    w = w / math.sqrt(D)
    score = jax.nn.softmax(w, axis=1)     # dim=1 == heads, as in the module
    o = jnp.einsum("bhlm,bhmd->bhld", score, v)
    o = o.transpose(0, 2, 1, 3).reshape(B, L, E)
    return o @ params["w_out"].T + params["b_out"]


if __name__ == "__main__":
    B, L, E, H = 2, 32, 32, 4
    key = jax.random.PRNGKey(0)
    kx, k1, k2, k3, k4 = jax.random.split(key, 5)
    x = jax.random.normal(kx, (B, L, E), dtype=jnp.float32)
    scale = 1.0 / math.sqrt(E)
    params = {
        "w_in": jax.random.uniform(k1, (3 * E, E), jnp.float32, -scale, scale),
        "b_in": jax.random.uniform(k2, (3 * E,), jnp.float32, -scale, scale),
        "w_out": jax.random.uniform(k3, (E, E), jnp.float32, -scale, scale),
        "b_out": jax.random.uniform(k4, (E,), jnp.float32, -scale, scale),
    }

    ref_c = self_attention_ref(x, params, n_heads=H, causal=True)
    ref_nc = self_attention_ref(x, params, n_heads=H, causal=False)

    # Single-block path (tq = tk = L), causal: reproduces the module's NaNs
    # (softmax over heads where every head is -inf).
    out_c = jax.block_until_ready(
        self_attention(x, params, n_heads=H, causal=True))
    assert out_c.shape == (B, L, E)
    assert np.allclose(np.asarray(out_c), np.asarray(ref_c),
                       atol=1e-4, rtol=1e-4, equal_nan=True)

    # Multi-block tiling path (attention grid = (B, 4, 4)), causal.
    out_c_t = jax.block_until_ready(
        self_attention(x, params, n_heads=H, causal=True, tq=8, tk=8))
    assert np.allclose(np.asarray(out_c_t), np.asarray(ref_c),
                       atol=1e-4, rtol=1e-4, equal_nan=True)

    # Non-causal: fully finite path, multi-block accumulation.
    out_nc = jax.block_until_ready(
        self_attention(x, params, n_heads=H, causal=False, tq=8, tk=8))
    assert np.allclose(np.asarray(out_nc), np.asarray(ref_nc),
                       atol=1e-4, rtol=1e-4)

    # bf16 MXU-input path (looser tolerance), non-causal.
    out_bf = jax.block_until_ready(
        self_attention(x, params, n_heads=H, causal=False,
                       compute_dtype=jnp.bfloat16))
    assert np.allclose(np.asarray(out_bf), np.asarray(ref_nc),
                       atol=5e-2, rtol=5e-2)

    print("KERNEL_OK")
</pallas_src>

<mosaic_0001>
module attributes {stable_mosaic.version = 11 : i64} {
  func.func @_linear_kernel(%arg0: i32, %arg1: i32, %arg2: i32, %arg3: memref<64x32xf32, #tpu.memory_space<vmem>>, %arg4: memref<32x96xf32, #tpu.memory_space<vmem>>, %arg5: memref<1x96xf32, #tpu.memory_space<vmem>>, %arg6: memref<64x96xf32, #tpu.memory_space<vmem>>, %arg7: memref<64x96xf32, #tpu.memory_space<vmem>>) attributes {dimension_semantics = [#tpu.dimension_semantics<parallel>, #tpu.dimension_semantics<parallel>, #tpu.dimension_semantics<arbitrary>], iteration_bounds = array<i64: 1, 1, 1>, scalar_prefetch = 0 : i64, scratch_operands = 1 : i64, tpu.core_type = #tpu.core_type<tc>, window_params = [{transform_indices = @transform_0, window_bounds = array<i64: 64, 32>}, {transform_indices = @transform_1, window_bounds = array<i64: 32, 96>}, {transform_indices = @transform_2, window_bounds = array<i64: 1, 96>}, {transform_indices = @transform_3, window_bounds = array<i64: 64, 96>}]} {
    %c0_i32 = arith.constant 0 : i32
    %0 = arith.cmpi eq, %arg2, %c0_i32 : i32
    %1 = arith.extui %0 : i1 to i32
    %c0_i32_0 = arith.constant 0 : i32
    %2 = arith.cmpi ne, %1, %c0_i32_0 : i32
    scf.if %2 {
      %cst_10 = arith.constant 0.000000e+00 : f32
      %12 = vector.broadcast %cst_10 : f32 to vector<64x96xf32>
      %c0_11 = arith.constant 0 : index
      %c0_12 = arith.constant 0 : index
      %13 = vector.load %arg7[%c0_11, %c0_12] : memref<64x96xf32, #tpu.memory_space<vmem>>, vector<64x96xf32>
      tpu.vector_store %arg7[%c0_11, %c0_12], %12 {strides = array<i32>} : memref<64x96xf32, #tpu.memory_space<vmem>>, vector<64x96xf32>,
    } else {
    }
    %c0 = arith.constant 0 : index
    %c0_1 = arith.constant 0 : index
    %3 = vector.load %arg7[%c0, %c0_1] : memref<64x96xf32, #tpu.memory_space<vmem>>, vector<64x96xf32>
    %c0_2 = arith.constant 0 : index
    %c0_3 = arith.constant 0 : index
    %4 = vector.load %arg3[%c0_2, %c0_3] : memref<64x32xf32, #tpu.memory_space<vmem>>, vector<64x32xf32>
    %c0_4 = arith.constant 0 : index
    %c0_5 = arith.constant 0 : index
    %5 = vector.load %arg4[%c0_4, %c0_5] : memref<32x96xf32, #tpu.memory_space<vmem>>, vector<32x96xf32>
    %cst = arith.constant dense<0.000000e+00> : vector<64x96xf32>
    %6 = tpu.matmul %4, %5, %cst {dimension_numbers = #tpu.dot_dimension_numbers<[1], [0], [0], [1], [0, 0, 1, 1], [], []>} : vector<64x32xf32>, vector<32x96xf32>, vector<64x96xf32> -> vector<64x96xf32>
    %7 = arith.addf %3, %6 : vector<64x96xf32>
    %c0_6 = arith.constant 0 : index
    %c0_7 = arith.constant 0 : index
    %8 = vector.load %arg7[%c0_6, %c0_7] : memref<64x96xf32, #tpu.memory_space<vmem>>, vector<64x96xf32>
    tpu.vector_store %arg7[%c0_6, %c0_7], %7 {strides = array<i32>} : memref<64x96xf32, #tpu.memory_space<vmem>>, vector<64x96xf32>,
    %c0_i32_8 = arith.constant 0 : i32
    %9 = arith.cmpi eq, %arg2, %c0_i32_8 : i32
    %10 = arith.extui %9 : i1 to i32
    %c0_i32_9 = arith.constant 0 : i32
    %11 = arith.cmpi ne, %10, %c0_i32_9 : i32
    scf.if %11 {
      %c0_10 = arith.constant 0 : index
      %c0_11 = arith.constant 0 : index
      %12 = vector.load %arg7[%c0_10, %c0_11] : memref<64x96xf32, #tpu.memory_space<vmem>>, vector<64x96xf32>
      %c0_12 = arith.constant 0 : index
      %c0_13 = arith.constant 0 : index
      %13 = vector.load %arg5[%c0_12, %c0_13] : memref<1x96xf32, #tpu.memory_space<vmem>>, vector<1x96xf32>
      %14 = vector.broadcast %13 : vector<1x96xf32> to vector<64x96xf32>
      %15 = arith.addf %12, %14 : vector<64x96xf32>
      %c0_14 = arith.constant 0 : index
      %c0_15 = arith.constant 0 : index
      %16 = vector.load %arg6[%c0_14, %c0_15] : memref<64x96xf32, #tpu.memory_space<vmem>>, vector<64x96xf32>
      tpu.vector_store %arg6[%c0_14, %c0_15], %15 {strides = array<i32>} : memref<64x96xf32, #tpu.memory_space<vmem>>, vector<64x96xf32>,
    } else {
    }
    return
  }
  func.func @transform_0(%arg0: i32, %arg1: i32, %arg2: i32) -> (i32, i32) {
    %c0_i32 = arith.constant 0 : i32
    return %arg0, %arg2 : i32, i32
  }
  func.func @transform_1(%arg0: i32, %arg1: i32, %arg2: i32) -> (i32, i32) {
    %c0_i32 = arith.constant 0 : i32
    return %arg2, %arg1 : i32, i32
  }
  func.func @transform_2(%arg0: i32, %arg1: i32, %arg2: i32) -> (i32, i32) {
    %c0_i32 = arith.constant 0 : i32
    %c0_i32_0 = arith.constant 0 : i32
    return %c0_i32, %arg1 : i32, i32
  }
  func.func @transform_3(%arg0: i32, %arg1: i32, %arg2: i32) -> (i32, i32) {
    %c0_i32 = arith.constant 0 : i32
    return %arg0, %arg1 : i32, i32
  }
}

</mosaic_0001>

<bundles_post_ra>
// kernel: tpu_custom_call.1
= control target key start
LH: loop header
LB: loop body
LE: loop exit
PB: predicated region body
PF: predicated region fallthrough
CT: control target
= control target key end

     0   :  { %vm19_vm0 = vcmask 785408   ;;  %v320_v2 = vmov 0.0   ;;  %s418_s0 = inlined_call_operand.vmem [shape: f32[64,32], index: 0, kind: input, shape index: {}]   ;;  %s419_s1 = inlined_call_operand.vmem [shape: f32[32,96], index: 1, kind: input, shape index: {}]   ;;  %s420_s2 = inlined_call_operand.vmem [shape: f32[1,96], index: 2, kind: input, shape index: {}]   ;;  %s421_s3 = inlined_call_operand.hbm [shape: f32[64,96], index: 3, kind: output, shape index: {}]  }
   0x1   :  { %v47_v0 = vld [vmem:[%s419_s1 + $0x18] sm:$0xff]  ;;  %v46_v1 = vld [vmem:[%s419_s1 + $0x10] sm:$0xff]  ;;  %21 = vst.msk [vmem:[#allocation2 + $0x8] sm:$0xff] %vm19_vm0, %v320_v2  ;;  %20 = vst.msk [vmem:[#allocation2] sm:$0xff] %vm19_vm0, %v320_v2 }
   0x2   :  { %266 = vmatprep.subr.mxu0 %v47_v0  ;;  %286 = vmatprep.subr.mxu1 %v47_v0  ;;  %22 = vst.msk [vmem:[#allocation2 + $0x10] sm:$0xff] %vm19_vm0, %v320_v2  ;;  %23 = vst.msk [vmem:[#allocation2 + $0x18] sm:$0xff] %vm19_vm0, %v320_v2  ;;  %v45_v3 = vld [vmem:[%s419_s1 + $0x8] sm:$0xff]  ;;  %v44_v4 = vld [vmem:[%s419_s1] sm:$0xff] }
   0x3   :  { %24 = vst.msk [vmem:[#allocation2 + $0x20] sm:$0xff] %vm19_vm0, %v320_v2  ;;  %25 = vst.msk [vmem:[#allocation2 + $0x28] sm:$0xff] %vm19_vm0, %v320_v2  ;;  %267 = vmatpush3.msra.mxu0 %v47_v0  ;;  %290 = vmatpush3.msra.mxu1 %v47_v0 }
   0x4   :  { %26 = vst.msk [vmem:[#allocation2 + $0x30] sm:$0xff] %vm19_vm0, %v320_v2  ;;  %27 = vst.msk [vmem:[#allocation2 + $0x38] sm:$0xff] %vm19_vm0, %v320_v2  ;;  %268 = vmatprep.subr.mxu0 %v46_v1  ;;  %287 = vmatprep.subr.mxu1 %v46_v1 }
   0x5   :  { %269 = vmatpush3.msra.mxu0 %v46_v1  ;;  %291 = vmatpush3.msra.mxu1 %v46_v1 }
   0x6   :  { %8 = vsyncpa [#allocation4], 0  ;;  %270 = vmatprep.subr.mxu0 %v45_v3  ;;  %288 = vmatprep.subr.mxu1 %v45_v3  ;;  %v36_v5 = vld [vmem:[%s418_s0] sm:$0xff]  ;;  %vm48_vm1 = vcmask 261120   ;;  %v37_v7 = vld [vmem:[%s418_s0 + $0x8] sm:$0xff]  ;;  %s321_s9 = smov [#allocation3]  }
   0x7   :  { %271 = vmatpush3.msra.mxu0 %v45_v3  ;;  %292 = vmatpush3.msra.mxu1 %v45_v3  ;;  %v40_v6 = vld [vmem:[%s418_s0 + $0x20] sm:$0xff]  ;;  %v41_v8 = vld [vmem:[%s418_s0 + $0x28] sm:$0xff]  ;;  %v38_v9 = vld [vmem:[%s418_s0 + $0x10] sm:$0xff]  ;;  %s234_s10 = sshll.u32 %s321_s9, 4  ;;  %s235_s10 = int_to_ptr.vmem [resolvable:$true] %s234_s10 }
   0x8   :  { %272 = vmatprep.subr.mxu0 %v44_v4  ;;  %289 = vmatprep.subr.mxu1 %v44_v4  ;;  %v42_v10 = vld [vmem:[%s418_s0 + $0x30] sm:$0xff]  ;;  %v39_v11 = vld [vmem:[%s418_s0 + $0x18] sm:$0xff]  ;;  %v29_v13 = vld [vmem:[#allocation2 + $0x8] sm:$0xff]  ;;  %p303_p1 = scmp.lt.s32.totalorder %s235_s10, %s235_s10 }
   0x9   :  { %273 = vmatpush3.msra.mxu0 %v44_v4  ;;  %293 = vmatpush3.msra.mxu1 %v44_v4  ;;  %v43_v12 = vld [vmem:[%s418_s0 + $0x38] sm:$0xff]  ;;  %v28_v17 = vld [vmem:[#allocation2] sm:$0xff]  ;;  %v30_v29 = vld [vmem:[#allocation2 + $0x10] sm:$0xff] }
   0xa   :  { %274 = vmatprep.mubr.msk.f32.mxu0 %vm48_vm1, %v36_v5  ;;  %280 = vmatprep.mubr.msk.f32.mxu1 %vm48_vm1, %v40_v6  ;;  %v33_v14 = vld [vmem:[#allocation2 + $0x28] sm:$0xff]  ;;  %v32_v18 = vld [vmem:[#allocation2 + $0x20] sm:$0xff]  ;;  %v31_v23 = vld [vmem:[#allocation2 + $0x18] sm:$0xff] }
   0xb   :  { %275 = vmatmul.mubr.msk.f32.vlgmr.msra.gmra.mxu0 %vm48_vm1, %v37_v7  ;;  %281 = vmatmul.mubr.msk.f32.vlgmr.msra.gmra.mxu1 %vm48_vm1, %v41_v8  ;;  %v35_v24 = vld [vmem:[#allocation2 + $0x38] sm:$0xff]  ;;  %v34_v30 = vld [vmem:[#allocation2 + $0x30] sm:$0xff]  ;;  %v253_v37 = vld [vmem:[%s420_s2] ss:$0 sm:$0xff]  ;;  %s298_s2 = scalar_lea.vmem %s235_s10, 1024 }
   0xc   :  { %277 = vmatprep.mubr.msk.f32.mxu0 %vm48_vm1, %v38_v9  ;;  %283 = vmatprep.mubr.msk.f32.mxu1 %vm48_vm1, %v42_v10  ;;  %p299_p0 = scmp.ne.s32.totalorder %s235_s10, %s298_s2  ;;  %p304_p2 = scmp.lt.s32.totalorder %s298_s2, %s298_s2 }
   0xe   :  { %p305_p3 = por %p304_p2, %p303_p1 }
   0xf   :  { %278 = vmatmul.mubr.msk.f32.gmra.mxu0 %vm48_vm1, %v39_v11  ;;  %284 = vmatmul.mubr.msk.f32.gmra.mxu1 %vm48_vm1, %v43_v12 }
  0x10   :  { %p306_p4 = pnand %p305_p3, %p299_p0 }
  0xcb   :  { %v276_v15 = vpop.f32.mrf.mxu0  ;;  %v282_v16 = vpop.f32.mrf.mxu1 }
  0xcc   :  { %v179_v19 = vadd.f32 %v276_v15, %v29_v13  ;;  %v183_v20 = vadd.f32 %v282_v16, %v33_v14 }
  0xcd   :  { %v139_v21 = vpop.f32.mrf.mxu0  ;;  %v159_v22 = vpop.f32.mrf.mxu1 }
  0xce   :  { %188 = vst.msk [vmem:[#allocation2 + $0x8] sm:$0xff] %vm19_vm0, %v179_v19  ;;  %192 = vst.msk [vmem:[#allocation2 + $0x28] sm:$0xff] %vm19_vm0, %v183_v20  ;;  %v178_v25 = vadd.f32 %v139_v21, %v28_v17  ;;  %v182_v26 = vadd.f32 %v159_v22, %v32_v18 }
  0xcf   :  { %v279_v27 = vpop.f32.mrf.mxu0  ;;  %v285_v28 = vpop.f32.mrf.mxu1 }
  0xd0   :  { %187 = vst.msk [vmem:[#allocation2] sm:$0xff] %vm19_vm0, %v178_v25  ;;  %191 = vst.msk [vmem:[#allocation2 + $0x20] sm:$0xff] %vm19_vm0, %v182_v26  ;;  %v181_v31 = vadd.f32 %v279_v27, %v31_v23  ;;  %v185_v32 = vadd.f32 %v285_v28, %v35_v24 }
  0xd1   :  { %v149_v33 = vpop.f32.mrf.mxu0  ;;  %v169_v34 = vpop.f32.mrf.mxu1 }
  0xd2   :  { %190 = vst.msk [vmem:[#allocation2 + $0x18] sm:$0xff] %vm19_vm0, %v181_v31  ;;  %194 = vst.msk [vmem:[#allocation2 + $0x38] sm:$0xff] %vm19_vm0, %v185_v32  ;;  %v180_v35 = vadd.f32 %v149_v33, %v30_v29  ;;  %v184_v36 = vadd.f32 %v169_v34, %v34_v30 }
  0xd4   :  { %189 = vst.msk [vmem:[#allocation2 + $0x10] sm:$0xff] %vm19_vm0, %v180_v35  ;;  %193 = vst.msk [vmem:[#allocation2 + $0x30] sm:$0xff] %vm19_vm0, %v184_v36 }
  0xd5   :  { %v199_v38 = vld [vmem:[#allocation2 + $0x8] sm:$0xff] }
  0xd6   :  { %v203_v39 = vld [vmem:[#allocation2 + $0x28] sm:$0xff]  ;;  %v214_v40 = vadd.f32 %v253_v37, %v199_v38 }
  0xd7   :  { %v218_v41 = vadd.f32 %v253_v37, %v203_v39  ;;  %v198_v42 = vld [vmem:[#allocation2] sm:$0xff] }
  0xd8   :  { %v202_v43 = vld [vmem:[#allocation2 + $0x20] sm:$0xff]  ;;  %v213_v44 = vadd.f32 %v253_v37, %v198_v42  ;;  %222 = vst.msk [vmem:[#allocation3 + $0x8] sm:$0xff] %vm19_vm0, %v214_v40 }
  0xd9   :  { %v217_v45 = vadd.f32 %v253_v37, %v202_v43  ;;  %226 = vst.msk [vmem:[#allocation3 + $0x28] sm:$0xff] %vm19_vm0, %v218_v41  ;;  %v201_v46 = vld [vmem:[#allocation2 + $0x18] sm:$0xff] }
  0xda   :  { %v205_v47 = vld [vmem:[#allocation2 + $0x38] sm:$0xff]  ;;  %v216_v48 = vadd.f32 %v253_v37, %v201_v46  ;;  %221 = vst.msk [vmem:[#allocation3] sm:$0xff] %vm19_vm0, %v213_v44 }
  0xdb   :  { %v220_v49 = vadd.f32 %v253_v37, %v205_v47  ;;  %225 = vst.msk [vmem:[#allocation3 + $0x20] sm:$0xff] %vm19_vm0, %v217_v45  ;;  %v200_v50 = vld [vmem:[#allocation2 + $0x10] sm:$0xff] }
  0xdc   :  { %v204_v51 = vld [vmem:[#allocation2 + $0x30] sm:$0xff]  ;;  %v215_v52 = vadd.f32 %v253_v37, %v200_v50  ;;  %224 = vst.msk [vmem:[#allocation3 + $0x18] sm:$0xff] %vm19_vm0, %v216_v48 }
  0xdd   :  { %v219_v53 = vadd.f32 %v253_v37, %v204_v51  ;;  %228 = vst.msk [vmem:[#allocation3 + $0x38] sm:$0xff] %vm19_vm0, %v220_v49 }
  0xde   :  { %223 = vst.msk [vmem:[#allocation3 + $0x10] sm:$0xff] %vm19_vm0, %v215_v52 }
  0xdf   :  { %227 = vst.msk [vmem:[#allocation3 + $0x30] sm:$0xff] %vm19_vm0, %v219_v53 }
  0xe0   :  { %309 = shalt.err (!%p306_p4)
}
  0xe1   :  { %s322_s11 = smov 128   ;;  %s323_s12 = smov 8  }
  0xe2   :  { %240 = dma.vmem_to_hbm [thread:$0]  %s235_s10, 1024, %s421_s3, [#allocation4], %s322_s11, %s322_s11, %s323_s12  }
  0xe3   :  { %318 = dma.done.wait [#allocation4], 1024  }
  0xe4   :  { %319 = vsyncadd [#allocation4], 4294966272 }
  0xe5   :  { %244 = vsyncpa [#allocation4], 1 }

</bundles_post_ra>
